<compile_context>
chip_gen: v5e
topology: v5e:2x2
jax: 0.10.0
libtpu: 0.0.40
codegen_flags: <defaults>
</compile_context>

<pallas_src>
import functools

import jax
import jax.numpy as jnp
from jax import lax
from jax.experimental import pallas as pl
from jax.experimental.pallas import tpu as pltpu


_LN_EPS = 1e-5


def _round_up(x, n):
    return ((x + n - 1) // n) * n


def _layernorm_rows(y, eps):
    # y: (TM, d_model) float32. gamma=1, beta=0 (fresh nn.LayerNorm each forward).
    inv_d = 1.0 / y.shape[-1]
    mean = jnp.sum(y, axis=-1, keepdims=True) * inv_d
    mean_sq = jnp.sum(y * y, axis=-1, keepdims=True) * inv_d
    var = mean_sq - mean * mean
    return (y - mean) * lax.rsqrt(var + eps)


def _ffn_ln_kernel_single(x_ref, w1_ref, w2_ref, o_ref, *, eps):
    """d_ff fits in one chunk: no accumulator scratch, no reduction grid axis."""
    x = x_ref[...]
    h = jnp.dot(x, w1_ref[...], preferred_element_type=jnp.float32)
    h = jnp.maximum(h, 0.0)
    acc = jnp.dot(h.astype(w2_ref.dtype), w2_ref[...],
                  preferred_element_type=jnp.float32)
    y = acc + x.astype(jnp.float32)
    o_ref[...] = _layernorm_rows(y, eps).astype(o_ref.dtype)


def _ffn_ln_kernel_ktiled(x_ref, w1_ref, w2_ref, o_ref, acc_ref, *, eps):
    """d_ff tiled on a trailing reduction axis. Exact because ReLU is
    elementwise over d_ff: sum_k relu(x @ W1_k) @ W2_k == relu(x @ W1) @ W2."""
    k = pl.program_id(1)
    nk = pl.num_programs(1)

    @pl.when(k == 0)
    def _():
        acc_ref[...] = jnp.zeros_like(acc_ref)

    # Native-dtype MXU operands, f32 accumulation.
    h = jnp.dot(x_ref[...], w1_ref[...], preferred_element_type=jnp.float32)
    h = jnp.maximum(h, 0.0)
    acc_ref[...] += jnp.dot(h.astype(w2_ref.dtype), w2_ref[...],
                            preferred_element_type=jnp.float32)

    @pl.when(k == nk - 1)
    def _():
        # residual + LayerNorm in f32, single-pass mean / variance.
        y = acc_ref[...] + x_ref[...].astype(jnp.float32)
        o_ref[...] = _layernorm_rows(y, eps).astype(o_ref.dtype)


def _pick_dff_tile(d_ff, tile_k):
    """Return (tk, d_ff_padded). Prefer a lane-aligned divisor of d_ff so the
    weights need no padding; otherwise zero-pad d_ff up to a multiple of tk."""
    if d_ff <= tile_k:
        return d_ff, d_ff
    if d_ff % tile_k == 0:
        return tile_k, d_ff
    cand = tile_k - (tile_k % 128)
    while cand >= 128:
        if d_ff % cand == 0:
            return cand, d_ff
        cand -= 128
    return tile_k, _round_up(d_ff, tile_k)


@functools.partial(jax.jit, static_argnames=("tile_m", "tile_k"))
def posiwise_ffn(inputs, w1, w2, *, tile_m=256, tile_k=512):
    """inputs: [B, S, d_model]; w1: [d_model, d_ff]; w2: [d_ff, d_model].

    w1 / w2 are the torch Linear weights pre-transposed so the kernel computes
    x @ w1 and h @ w2 directly on the MXU.
    """
    b, s, d_model = inputs.shape
    d_ff = w1.shape[1]
    assert w1.shape == (d_model, d_ff)
    assert w2.shape == (d_ff, d_model)

    m = b * s
    x2d = inputs.reshape(m, d_model)

    # Row tile: large, sublane(8)-aligned. Ragged boundaries handled by Pallas
    # (reads past the end are ignored garbage, writes past the end dropped).
    tm = min(tile_m, _round_up(m, 8))
    grid_m = pl.cdiv(m, tm)

    tk, dff_pad = _pick_dff_tile(d_ff, tile_k)
    if dff_pad != d_ff:
        # Zero padding is exact: padded W1 columns / W2 rows contribute 0.
        w1 = jnp.pad(w1, ((0, 0), (0, dff_pad - d_ff)))
        w2 = jnp.pad(w2, ((0, dff_pad - d_ff), (0, 0)))
    grid_k = dff_pad // tk

    x_it = jnp.dtype(inputs.dtype).itemsize
    w_it = jnp.dtype(w1.dtype).itemsize
    cost = pl.CostEstimate(
        flops=4 * m * d_model * d_ff,            # two matmuls
        transcendentals=m,                       # one rsqrt per row
        bytes_accessed=int(2 * m * d_model * x_it
                           + grid_m * (w1.size + w2.size) * w_it),
    )
    out_shape = jax.ShapeDtypeStruct((m, d_model), inputs.dtype)

    # Explicit VMEM budget (double-buffered streams + scratch + hidden tile),
    # clamped so it stays safe on v7x's 64 MiB parts.
    vmem_est = (2 * tm * d_model * x_it          # x tiles
                + 2 * d_model * tk * w_it        # W1 panels
                + 2 * tk * d_model * w_it        # W2 panels
                + 2 * tm * d_model * x_it        # output tiles
                + tm * d_model * 4               # f32 accumulator
                + tm * tk * 4)                   # f32 hidden activation chunk
    vmem_limit = int(min(max(2 * vmem_est + (2 << 20), 16 << 20), 64 << 20))

    if grid_k == 1:
        out2d = pl.pallas_call(
            functools.partial(_ffn_ln_kernel_single, eps=_LN_EPS),
            out_shape=out_shape,
            grid_spec=pltpu.PrefetchScalarGridSpec(
                num_scalar_prefetch=0,
                grid=(grid_m,),
                in_specs=[
                    pl.BlockSpec((tm, d_model), lambda i: (i, 0)),
                    pl.BlockSpec((d_model, tk), lambda i: (0, 0)),
                    pl.BlockSpec((tk, d_model), lambda i: (0, 0)),
                ],
                out_specs=pl.BlockSpec((tm, d_model), lambda i: (i, 0)),
            ),
            compiler_params=pltpu.CompilerParams(
                dimension_semantics=("parallel",),
                vmem_limit_bytes=vmem_limit),
            cost_estimate=cost,
        )(x2d, w1, w2)
    else:
        out2d = pl.pallas_call(
            functools.partial(_ffn_ln_kernel_ktiled, eps=_LN_EPS),
            out_shape=out_shape,
            grid_spec=pltpu.PrefetchScalarGridSpec(
                num_scalar_prefetch=0,
                grid=(grid_m, grid_k),
                in_specs=[
                    pl.BlockSpec((tm, d_model), lambda i, k: (i, 0)),
                    pl.BlockSpec((d_model, tk), lambda i, k: (0, k)),
                    pl.BlockSpec((tk, d_model), lambda i, k: (k, 0)),
                ],
                out_specs=pl.BlockSpec((tm, d_model), lambda i, k: (i, 0)),
                scratch_shapes=[pltpu.VMEM((tm, d_model), jnp.float32)],
            ),
            compiler_params=pltpu.CompilerParams(
                dimension_semantics=("parallel", "arbitrary"),
                vmem_limit_bytes=vmem_limit),
            cost_estimate=cost,
        )(x2d, w1, w2)

    return out2d.reshape(b, s, d_model)


def _reference(inputs, w1, w2):
    x = inputs.astype(jnp.float32)
    y = jnp.maximum(x @ w1.astype(jnp.float32), 0.0) @ w2.astype(jnp.float32) + x
    mean = jnp.mean(y, axis=-1, keepdims=True)
    var = jnp.mean((y - mean) ** 2, axis=-1, keepdims=True)
    return (y - mean) * lax.rsqrt(var + _LN_EPS)


if __name__ == "__main__":
    # Small, module-consistent shapes: [batch_size, seq_len, d_model]
    batch, seq_len, d_model, d_ff = 2, 8, 32, 64

    key = jax.random.PRNGKey(0)
    kx, k1, k2 = jax.random.split(key, 3)

    x = jax.random.normal(kx, (batch, seq_len, d_model), dtype=jnp.float32)
    # Deterministic synthetic weights (stand-in for torch Linear weights, transposed)
    w1 = jax.random.normal(k1, (d_model, d_ff), dtype=jnp.float32) * 0.1
    w2 = jax.random.normal(k2, (d_ff, d_model), dtype=jnp.float32) * 0.1

    out = jax.block_until_ready(posiwise_ffn(x, w1, w2))
    ref = _reference(x, w1, w2)
    assert out.shape == (batch, seq_len, d_model)
    assert jnp.allclose(out, ref, atol=1e-4, rtol=1e-4), "mismatch vs reference"

    # Exercise the ragged-row boundary and d_ff reduction-axis (K-tiled) paths.
    d_ff2 = 200  # no 128-aligned divisor <= 128 -> zero-padded to 256
    kx2, k3, k4 = jax.random.split(k2, 3)
    x2 = jax.random.normal(kx2, (3, 37, d_model), dtype=jnp.float32)  # 111 rows
    w1b = jax.random.normal(k3, (d_model, d_ff2), dtype=jnp.float32) * 0.1
    w2b = jax.random.normal(k4, (d_ff2, d_model), dtype=jnp.float32) * 0.1
    out2 = jax.block_until_ready(posiwise_ffn(x2, w1b, w2b, tile_m=64, tile_k=128))
    ref2 = _reference(x2, w1b, w2b)
    assert out2.shape == x2.shape
    assert jnp.allclose(out2, ref2, atol=1e-4, rtol=1e-4), "mismatch (ragged / K-tiled)"

    print("KERNEL_OK")
</pallas_src>

<mosaic_0001>
module attributes {stable_mosaic.version = 11 : i64} {
  func.func @_ffn_ln_kernel_single(%arg0: i32, %arg1: memref<16x32xf32, #tpu.memory_space<vmem>>, %arg2: memref<32x64xf32, #tpu.memory_space<vmem>>, %arg3: memref<64x32xf32, #tpu.memory_space<vmem>>, %arg4: memref<16x32xf32, #tpu.memory_space<vmem>>) attributes {dimension_semantics = [#tpu.dimension_semantics<parallel>], iteration_bounds = array<i64: 1>, scalar_prefetch = 0 : i64, scratch_operands = 0 : i64, tpu.core_type = #tpu.core_type<tc>, window_params = [{transform_indices = @transform_0, window_bounds = array<i64: 16, 32>}, {pipeline_mode = #tpu.pipeline_mode<synchronous>, transform_indices = @transform_1, window_bounds = array<i64: 32, 64>}, {pipeline_mode = #tpu.pipeline_mode<synchronous>, transform_indices = @transform_2, window_bounds = array<i64: 64, 32>}, {transform_indices = @transform_3, window_bounds = array<i64: 16, 32>}]} {
    %c0 = arith.constant 0 : index
    %c0_0 = arith.constant 0 : index
    %0 = vector.load %arg1[%c0, %c0_0] : memref<16x32xf32, #tpu.memory_space<vmem>>, vector<16x32xf32>
    %c0_1 = arith.constant 0 : index
    %c0_2 = arith.constant 0 : index
    %1 = vector.load %arg2[%c0_1, %c0_2] : memref<32x64xf32, #tpu.memory_space<vmem>>, vector<32x64xf32>
    %cst = arith.constant dense<0.000000e+00> : vector<16x64xf32>
    %2 = tpu.matmul %0, %1, %cst {dimension_numbers = #tpu.dot_dimension_numbers<[1], [0], [0], [1], [0, 0, 1, 1], [], []>} : vector<16x32xf32>, vector<32x64xf32>, vector<16x64xf32> -> vector<16x64xf32>
    %cst_3 = arith.constant 0.000000e+00 : f32
    %3 = vector.broadcast %cst_3 : f32 to vector<16x64xf32>
    %4 = arith.maximumf %2, %3 : vector<16x64xf32>
    %c0_4 = arith.constant 0 : index
    %c0_5 = arith.constant 0 : index
    %5 = vector.load %arg3[%c0_4, %c0_5] : memref<64x32xf32, #tpu.memory_space<vmem>>, vector<64x32xf32>
    %cst_6 = arith.constant dense<0.000000e+00> : vector<16x32xf32>
    %6 = tpu.matmul %4, %5, %cst_6 {dimension_numbers = #tpu.dot_dimension_numbers<[1], [0], [0], [1], [0, 0, 1, 1], [], []>} : vector<16x64xf32>, vector<64x32xf32>, vector<16x32xf32> -> vector<16x32xf32>
    %7 = arith.addf %6, %0 : vector<16x32xf32>
    %cst_7 = arith.constant dense<0.000000e+00> : vector<16xf32>
    %8 = vector.multi_reduction <add>, %7, %cst_7 [1] : vector<16x32xf32> to vector<16xf32>
    %9 = vector.shape_cast %8 : vector<16xf32> to vector<16x1xf32>
    %cst_8 = arith.constant 3.125000e-02 : f32
    %10 = vector.broadcast %cst_8 : f32 to vector<16x1xf32>
    %11 = arith.mulf %9, %10 : vector<16x1xf32>
    %12 = arith.mulf %7, %7 : vector<16x32xf32>
    %cst_9 = arith.constant dense<0.000000e+00> : vector<16xf32>
    %13 = vector.multi_reduction <add>, %12, %cst_9 [1] : vector<16x32xf32> to vector<16xf32>
    %14 = vector.shape_cast %13 : vector<16xf32> to vector<16x1xf32>
    %cst_10 = arith.constant 3.125000e-02 : f32
    %15 = vector.broadcast %cst_10 : f32 to vector<16x1xf32>
    %16 = arith.mulf %14, %15 : vector<16x1xf32>
    %17 = arith.mulf %11, %11 : vector<16x1xf32>
    %18 = arith.subf %16, %17 : vector<16x1xf32>
    %19 = vector.broadcast %11 : vector<16x1xf32> to vector<16x32xf32>
    %20 = arith.subf %7, %19 : vector<16x32xf32>
    %cst_11 = arith.constant 9.99999974E-6 : f32
    %21 = vector.broadcast %cst_11 : f32 to vector<16x1xf32>
    %22 = arith.addf %18, %21 : vector<16x1xf32>
    %23 = math.rsqrt %22 : vector<16x1xf32>
    %24 = vector.broadcast %23 : vector<16x1xf32> to vector<16x32xf32>
    %25 = arith.mulf %20, %24 : vector<16x32xf32>
    %c0_12 = arith.constant 0 : index
    %c0_13 = arith.constant 0 : index
    %26 = vector.load %arg4[%c0_12, %c0_13] : memref<16x32xf32, #tpu.memory_space<vmem>>, vector<16x32xf32>
    tpu.vector_store %arg4[%c0_12, %c0_13], %25 {strides = array<i32>} : memref<16x32xf32, #tpu.memory_space<vmem>>, vector<16x32xf32>,
    return
  }
  func.func @transform_0(%arg0: i32) -> (i32, i32) {
    %c0_i32 = arith.constant 0 : i32
    %c0_i32_0 = arith.constant 0 : i32
    return %arg0, %c0_i32 : i32, i32
  }
  func.func @transform_1(%arg0: i32) -> (i32, i32) {
    %c0_i32 = arith.constant 0 : i32
    %c0_i32_0 = arith.constant 0 : i32
    %c0_i32_1 = arith.constant 0 : i32
    return %c0_i32, %c0_i32_0 : i32, i32
  }
  func.func @transform_2(%arg0: i32) -> (i32, i32) {
    %c0_i32 = arith.constant 0 : i32
    %c0_i32_0 = arith.constant 0 : i32
    %c0_i32_1 = arith.constant 0 : i32
    return %c0_i32, %c0_i32_0 : i32, i32
  }
  func.func @transform_3(%arg0: i32) -> (i32, i32) {
    %c0_i32 = arith.constant 0 : i32
    %c0_i32_0 = arith.constant 0 : i32
    return %arg0, %c0_i32 : i32, i32
  }
}

</mosaic_0001>

<bundles_post_ra>
// kernel: posiwise_ffn.1
= control target key start
LH: loop header
LB: loop body
LE: loop exit
PB: predicated region body
PF: predicated region fallthrough
CT: control target
= control target key end

     0   :  { %s284_s0 = inlined_call_operand.vmem [shape: f32[16,32], index: 0, kind: input, shape index: {}]   ;;  %s285_s1 = inlined_call_operand.vmem [shape: f32[32,64], index: 1, kind: input, shape index: {}]   ;;  %s286_s2 = inlined_call_operand.vmem [shape: f32[64,32], index: 2, kind: input, shape index: {}]   ;;  %s287_s3 = inlined_call_operand.hbm [shape: f32[16,32], index: 3, kind: output, shape index: {}]  }
   0x1   :  { %v20_v0 = vld [vmem:[%s285_s1 + $0x18] sm:$0xff]  ;;  %v19_v1 = vld [vmem:[%s285_s1 + $0x10] sm:$0xff]  ;;  %v18_v2 = vld [vmem:[%s285_s1 + $0x8] sm:$0xff] }
   0x2   :  { %40 = vmatpush.msra.mxu0 %v20_v0  ;;  %163 = vmatpush.msra.mxu3 %v20_v0  ;;  %v60_v3 = vld [vmem:[%s286_s2 + $0x38] sm:$0xff]  ;;  %v59_v4 = vld [vmem:[%s286_s2 + $0x30] sm:$0xff]  ;;  %v17_v5 = vld [vmem:[%s285_s1] sm:$0xff] }
   0x3   :  { %76 = vmatpush.msra.mxu1 %v60_v3  ;;  %167 = vmatpush.msra.mxu2 %v60_v3 }
   0x4   :  { %41 = vmatpush.msra.mxu0 %v19_v1  ;;  %164 = vmatpush.msra.mxu3 %v19_v1 }
   0x5   :  { %8 = vsyncpa [#allocation3], 0  ;;  %v15_v6 = vld [vmem:[%s284_s0] sm:$0xff]  ;;  %vm21_vm0 = vcmask 261120   ;;  %v16_v7 = vld [vmem:[%s284_s0 + $0x8] sm:$0xff]  ;;  %77 = vmatpush.msra.mxu1 %v59_v4  ;;  %168 = vmatpush.msra.mxu2 %v59_v4  ;;  %vm61_vm1 = vcmask 523264  }
   0x6   :  { %42 = vmatpush.msra.mxu0 %v18_v2  ;;  %165 = vmatpush.msra.mxu3 %v18_v2  ;;  %v58_v8 = vld [vmem:[%s286_s2 + $0x28] sm:$0xff]  ;;  %v57_v9 = vld [vmem:[%s286_s2 + $0x20] sm:$0xff]  ;;  %v56_v10 = vld [vmem:[%s286_s2 + $0x18] sm:$0xff]  ;;  %s147_s14 = sshll.u32 %s287_s3, 4  ;;  %s209_s15 = smov 128   ;;  %s148_s14 = int_to_ptr.hbm [resolvable:$true] %s147_s14 }
   0x7   :  { %78 = vmatpush.msra.mxu1 %v58_v8  ;;  %169 = vmatpush.msra.mxu2 %v58_v8  ;;  %v55_v11 = vld [vmem:[%s286_s2 + $0x10] sm:$0xff]  ;;  %v54_v12 = vld [vmem:[%s286_s2 + $0x8] sm:$0xff]  ;;  %v53_v13 = vld [vmem:[%s286_s2] sm:$0xff]  ;;  %s208_s2 = smov [#allocation2]   ;;  %s210_s16 = smov 8  }
   0x8   :  { %43 = vmatpush.msra.mxu0 %v17_v5  ;;  %166 = vmatpush.msra.mxu3 %v17_v5  ;;  %s145_s11 = sshll.u32 %s208_s2, 4  ;;  %s146_s11 = int_to_ptr.vmem [resolvable:$true] %s145_s11 }
   0x9   :  { %159 = vmatmul.msk.f32.vlgmr.msra.gmra.mxu0 %vm21_vm0, %v15_v6  ;;  %160 = vmatmul.msk.f32.vlgmr.msra.gmra.mxu3 %vm21_vm0, %v16_v7 }
   0xa   :  { %79 = vmatpush.msra.mxu1 %v57_v9  ;;  %170 = vmatpush.msra.mxu2 %v57_v9 }
   0xc   :  { %80 = vmatpush.msra.mxu1 %v56_v10  ;;  %171 = vmatpush.msra.mxu2 %v56_v10 }
   0xe   :  { %81 = vmatpush.msra.mxu1 %v55_v11  ;;  %172 = vmatpush.msra.mxu2 %v55_v11 }
  0x10   :  { %82 = vmatpush.msra.mxu1 %v54_v12  ;;  %173 = vmatpush.msra.mxu2 %v54_v12 }
  0x12   :  { %83 = vmatpush.msra.mxu1 %v53_v13  ;;  %174 = vmatpush.msra.mxu2 %v53_v13 }
  0x86   :  { %v45_v14 = vpop.f32.mrf.mxu0 }
  0x87   :  { %v51_v15 = vmax.f32 %v45_v14, 0.0 }
  0x89   :  { %161 = vmatmul.msk.f32.vlgmr.msra.gmra.mxu1 %vm61_vm1, %v51_v15 }
  0x8c   :  { %v48_v16 = vpop.f32.mrf.mxu3 }
  0x8d   :  { %v52_v17 = vmax.f32 %v48_v16, 0.0 }
  0x8f   :  { %162 = vmatmul.msk.f32.vlgmr.msra.gmra.mxu2 %vm61_vm1, %v52_v17 }
 0x106   :  { %v85_v18 = vpop.f32.mrf.mxu1 }
 0x107   :  { %v86_v19 = vadd.f32 %v85_v18, %v15_v6 }
 0x109   :  { %v91_v20 = vsel %vm21_vm0, %v86_v19, 0.0  ;;  %v99_v21 = vmul.f32 %v86_v19, %v86_v19 }
 0x10a   :  { %92 = vadd.xlane.f32.xlu0 %v91_v20 }
 0x10b   :  { %v101_v22 = vsel %vm21_vm0, %v99_v21, 0.0 }
 0x10c   :  { %102 = vadd.xlane.f32.xlu1 %v101_v22 }
 0x112   :  { %v88_v23 = vpop.f32.mrf.mxu2 }
 0x113   :  { %v89_v24 = vadd.f32 %v88_v23, %v16_v7 }
 0x115   :  { %v94_v25 = vsel %vm21_vm0, %v89_v24, 0.0  ;;  %v100_v26 = vmul.f32 %v89_v24, %v89_v24 }
 0x116   :  { %95 = vadd.xlane.f32.xlu0 %v94_v25 }
 0x117   :  { %v104_v27 = vsel %vm21_vm0, %v100_v26, 0.0 }
 0x118   :  { %105 = vadd.xlane.f32.xlu1 %v104_v27 }
 0x17d   :  { %v93_v28 = vpop.xlane.xlu0 %92 }
 0x17e   :  { %v97_v29 = vmul.f32 0.03125, %v93_v28 }
 0x17f   :  { %v103_v30 = vpop.xlane.xlu1 %102 }
 0x180   :  { %v109_v31 = vmul.f32 %v97_v29, %v97_v29  ;;  %v107_v32 = vmul.f32 0.03125, %v103_v30  ;;  %v113_v48 = vsub.f32 %v86_v19, %v97_v29 }
 0x182   :  { %v111_v33 = vsub.f32 %v107_v32, %v109_v31 }
 0x184   :  { %v115_v34 = vadd.f32 1e-05, %v111_v33 }
 0x186   :  { %178 = vrsqrt.f32 %v115_v34  ;;  %vm123_vm3 = vweird.f32 %v115_v34 }
 0x189   :  { %v96_v35 = vpop.xlane.xlu0 %95 }
 0x18a   :  { %v98_v36 = vmul.f32 0.03125, %v96_v35 }
 0x18b   :  { %v106_v37 = vpop.xlane.xlu1 %105 }
 0x18c   :  { %v179_v38 = vpop.eup %178  ;;  %v110_v39 = vmul.f32 %v98_v36, %v98_v36  ;;  %v108_v40 = vmul.f32 0.03125, %v106_v37  ;;  %v114_v57 = vsub.f32 %v89_v24, %v98_v36 }
 0x18d   :  { %v118_v41 = vmul.f32 %v179_v38, %v115_v34  ;;  %vm124_vm2 = vweird.f32 %v179_v38 }
 0x18e   :  { %v112_v42 = vsub.f32 %v108_v40, %v110_v39  ;;  %vm125_vm4 = vmor %vm123_vm3, %vm124_vm2 }
 0x18f   :  { %v119_v43 = vmul.f32 %v179_v38, %v118_v41 }
 0x190   :  { %v116_v44 = vadd.f32 1e-05, %v112_v42 }
 0x191   :  { %v120_v45 = vmul.f32 0.5, %v119_v43 }
 0x192   :  { %180 = vrsqrt.f32 %v116_v44  ;;  %vm133_vm6 = vweird.f32 %v116_v44 }
 0x193   :  { %v121_v46 = vsub.f32 1.5, %v120_v45 }
 0x195   :  { %v122_v47 = vmul.f32 %v179_v38, %v121_v46 }
 0x197   :  { %v126_v49 = vsel %vm125_vm4, %v179_v38, %v122_v47 }
 0x198   :  { %v181_v50 = vpop.eup %180  ;;  %v137_v51 = vmul.f32 %v126_v49, %v113_v48 }
 0x199   :  { %v128_v52 = vmul.f32 %v181_v50, %v116_v44  ;;  %vm134_vm5 = vweird.f32 %v181_v50 }
 0x19a   :  { %139 = vst.msk [vmem:[#allocation2] sm:$0xff] %vm21_vm0, %v137_v51  ;;  %vm135_vm7 = vmor %vm133_vm6, %vm134_vm5 }
 0x19b   :  { %v129_v53 = vmul.f32 %v181_v50, %v128_v52 }
 0x19d   :  { %v130_v54 = vmul.f32 0.5, %v129_v53 }
 0x19f   :  { %v131_v55 = vsub.f32 1.5, %v130_v54 }
 0x1a1   :  { %v132_v56 = vmul.f32 %v181_v50, %v131_v55 }
 0x1a3   :  { %v136_v58 = vsel %vm135_vm7, %v181_v50, %v132_v56 }
 0x1a4   :  { %v138_v59 = vmul.f32 %v136_v58, %v114_v57 }
 0x1a6   :  { %140 = vst.msk [vmem:[#allocation2 + $0x8] sm:$0xff] %vm21_vm0, %v138_v59 }
 0x1a7   :  { %153 = dma.vmem_to_hbm [thread:$0]  %s146_s11, 256, %s148_s14, [#allocation3], %s209_s15, %s209_s15, %s210_s16  }
 0x1a8   :  { %206 = dma.done.wait [#allocation3], 256  }
 0x1a9   :  { %207 = vsyncadd [#allocation3], 4294967040 }
 0x1aa   :  { %158 = vsyncpa [#allocation3], 1 }

</bundles_post_ra>
